<compile_context>
chip_gen: v6e
topology: v6e:2x2x1
jax: 0.10.0
libtpu: 0.0.40
codegen_flags: <defaults>
</compile_context>

<pallas_src>
import jax
import jax.numpy as jnp
from jax.experimental import pallas as pl
from jax.experimental.pallas import tpu as pltpu

_LANES = 128         # lane width (batch axis tiling unit)
_OUT_SUBLANES = 8    # output slab rows; row 0 carries y^T, rows 1..7 are zero


def _round_up(n, m):
    return -(-n // m) * m


def _num_tensorcores_per_chip():
    """2 tiles only pay off on v7x (2 TCs/chip); v5e/v6e have 1 TC."""
    try:
        kind = jax.devices()[0].device_kind.lower().replace(" ", "")
        if "v7" in kind or "tpu7" in kind:
            return 2
    except Exception:
        pass
    return 1


_NUM_TC = _num_tensorcores_per_chip()


def pack_params(w1, b1, w2, b2):
    """Pack (W1, b1, W2, b2) into two small constant f32 operands.

    w1t_aug (H_AUG, F_PAD):
      rows 0..H-1, cols 0..F-1 : W1^T
      rows 0..H-1, col  F      : b1          (picked up by the constant-1 feature row)
      row  H,      col  F      : 1.0         (constant-1 hidden unit; relu(1) == 1)
    w2_blk (8, H_AUG):
      row 0, cols 0..H-1 : W2 (as a row vector)
      row 0, col  H      : b2
    """
    F, H = w1.shape
    O = w2.shape[1]
    assert O == 1, "packing assumes out_features == 1"
    f_pad = _round_up(F + 1, 8)
    h_aug = _round_up(H + 1, 8)

    w1t = jnp.zeros((h_aug, f_pad), jnp.float32)
    w1t = w1t.at[:H, :F].set(jnp.asarray(w1, jnp.float32).T)
    w1t = w1t.at[:H, F].set(jnp.asarray(b1, jnp.float32).reshape(-1))
    w1t = w1t.at[H, F].set(1.0)

    w2b = jnp.zeros((_OUT_SUBLANES, h_aug), jnp.float32)
    w2b = w2b.at[0, :H].set(jnp.asarray(w2, jnp.float32).reshape(-1))
    w2b = w2b.at[0, H].set(jnp.asarray(b2, jnp.float32).reshape(-1)[0])
    return w1t, w2b


def _mlp_kernel(xt_ref, w1t_ref, w2b_ref, o_ref):
    xt = xt_ref[...]                        # (F_PAD, TILE_B)  batch on lanes
    w1t = w1t_ref[...]                      # (H_AUG, F_PAD)
    w2b = w2b_ref[...]                      # (8, H_AUG)
    # Layer 1 (+ b1 via constant-1 feature row): MXU matmul, VPU relu.
    h = jnp.maximum(jnp.dot(w1t, xt, preferred_element_type=jnp.float32), 0.0)
    # Layer 2 (+ b2 via constant-1 hidden unit): second MXU matmul.
    # Result is an (8, TILE_B) lane-dense slab -> unmasked stores.
    o_ref[...] = jnp.dot(w2b, h, preferred_element_type=jnp.float32).astype(o_ref.dtype)


def boston_model_forward(x, w1t_aug, w2_blk):
    """x: (B, F) f32; (w1t_aug, w2_blk) from pack_params().  Returns (B, 1)."""
    B, F = x.shape
    h_aug, f_pad = w1t_aug.shape
    assert w2_blk.shape == (_OUT_SUBLANES, h_aug)
    assert F + 1 <= f_pad

    # 1 tile on v5e/v6e (1 TC); exactly 2 parallel tiles on v7x when batch allows.
    num_tiles = 2 if (_NUM_TC >= 2 and B > _LANES) else 1
    b_pad = _round_up(max(B, _LANES), _LANES * num_tiles)
    tile_b = b_pad // num_tiles

    # Transpose + pad so the batch sits on the lane axis; row F is the
    # constant-1 feature that carries the layer-1 bias.
    x_t = jnp.zeros((f_pad, b_pad), jnp.float32)
    x_t = x_t.at[:F, :B].set(jnp.transpose(x).astype(jnp.float32))
    x_t = x_t.at[F, :].set(1.0)

    grid_spec = pltpu.PrefetchScalarGridSpec(
        num_scalar_prefetch=0,
        grid=(num_tiles,),
        in_specs=[
            pl.BlockSpec((f_pad, tile_b), lambda i: (0, i)),            # x^T tile
            pl.BlockSpec((h_aug, f_pad), lambda i: (0, 0)),             # W1^T (resident)
            pl.BlockSpec((_OUT_SUBLANES, h_aug), lambda i: (0, 0)),     # W2 block (resident)
        ],
        out_specs=pl.BlockSpec((_OUT_SUBLANES, tile_b), lambda i: (0, i)),
    )
    out_t = pl.pallas_call(
        _mlp_kernel,
        out_shape=jax.ShapeDtypeStruct((_OUT_SUBLANES, b_pad), jnp.float32),
        grid_spec=grid_spec,
        compiler_params=pltpu.CompilerParams(
            dimension_semantics=(("parallel",) if num_tiles > 1 else ("arbitrary",))),
    )(x_t, w1t_aug, w2_blk)

    # Row 0 holds y^T; rows 1..7 are layout padding (zeros).
    return out_t[0, :B].reshape(B, 1)


def init_params(key, in_features, hidden, out_features):
    """Deterministic synthetic init (uniform, PyTorch-Linear-like bounds)."""
    k1, k2, k3, k4 = jax.random.split(key, 4)
    bound1 = 1.0 / jnp.sqrt(in_features)
    bound2 = 1.0 / jnp.sqrt(hidden)
    w1 = jax.random.uniform(k1, (in_features, hidden), jnp.float32, -bound1, bound1)
    b1 = jax.random.uniform(k2, (1, hidden), jnp.float32, -bound1, bound1)
    w2 = jax.random.uniform(k3, (hidden, out_features), jnp.float32, -bound2, bound2)
    b2 = jax.random.uniform(k4, (1, out_features), jnp.float32, -bound2, bound2)
    return w1, b1, w2, b2


if __name__ == "__main__":
    # Boston housing: 13 input features, 1 regression target; small batch.
    # (lr / epochs / bs / gamma are training hyperparameters — no forward role.)
    B, F, H, O = 8, 13, 64, 1
    key = jax.random.PRNGKey(0)
    kx, kp = jax.random.split(key)
    x = jax.random.normal(kx, (B, F), jnp.float32)
    w1, b1, w2, b2 = init_params(kp, F, H, O)

    # Pack once (constant weights); reuse across forward calls.
    w1t_aug, w2_blk = pack_params(w1, b1, w2, b2)

    fwd = jax.jit(boston_model_forward)  # pad/transpose/slice fuse into one jit
    out = jax.block_until_ready(fwd(x, w1t_aug, w2_blk))

    # Pure-JAX reference of the same forward pass.
    ref = jnp.maximum(x @ w1 + b1, 0.0) @ w2 + b2
    assert out.shape == (B, O)
    assert jnp.allclose(out, ref, atol=1e-5, rtol=1e-5)

    print("KERNEL_OK")
</pallas_src>

<mosaic_0001>
module attributes {stable_mosaic.version = 11 : i64} {
  func.func @_mlp_kernel(%arg0: i32, %arg1: memref<16x128xf32, #tpu.memory_space<vmem>>, %arg2: memref<72x16xf32, #tpu.memory_space<vmem>>, %arg3: memref<8x72xf32, #tpu.memory_space<vmem>>, %arg4: memref<8x128xf32, #tpu.memory_space<vmem>>) attributes {dimension_semantics = [#tpu.dimension_semantics<arbitrary>], iteration_bounds = array<i64: 1>, scalar_prefetch = 0 : i64, scratch_operands = 0 : i64, tpu.core_type = #tpu.core_type<tc>, window_params = [{transform_indices = @transform_0, window_bounds = array<i64: 16, 128>}, {pipeline_mode = #tpu.pipeline_mode<synchronous>, transform_indices = @transform_1, window_bounds = array<i64: 72, 16>}, {pipeline_mode = #tpu.pipeline_mode<synchronous>, transform_indices = @transform_2, window_bounds = array<i64: 8, 72>}, {transform_indices = @transform_3, window_bounds = array<i64: 8, 128>}]} {
    %c0 = arith.constant 0 : index
    %c0_0 = arith.constant 0 : index
    %0 = vector.load %arg1[%c0, %c0_0] : memref<16x128xf32, #tpu.memory_space<vmem>>, vector<16x128xf32>
    %c0_1 = arith.constant 0 : index
    %c0_2 = arith.constant 0 : index
    %1 = vector.load %arg2[%c0_1, %c0_2] : memref<72x16xf32, #tpu.memory_space<vmem>>, vector<72x16xf32>
    %c0_3 = arith.constant 0 : index
    %c0_4 = arith.constant 0 : index
    %2 = vector.load %arg3[%c0_3, %c0_4] : memref<8x72xf32, #tpu.memory_space<vmem>>, vector<8x72xf32>
    %cst = arith.constant dense<0.000000e+00> : vector<72x128xf32>
    %3 = tpu.matmul %1, %0, %cst {dimension_numbers = #tpu.dot_dimension_numbers<[1], [0], [0], [1], [0, 0, 1, 1], [], []>} : vector<72x16xf32>, vector<16x128xf32>, vector<72x128xf32> -> vector<72x128xf32>
    %cst_5 = arith.constant 0.000000e+00 : f32
    %4 = vector.broadcast %cst_5 : f32 to vector<72x128xf32>
    %5 = arith.maximumf %3, %4 : vector<72x128xf32>
    %cst_6 = arith.constant dense<0.000000e+00> : vector<8x128xf32>
    %6 = tpu.matmul %2, %5, %cst_6 {dimension_numbers = #tpu.dot_dimension_numbers<[1], [0], [0], [1], [0, 0, 1, 1], [], []>} : vector<8x72xf32>, vector<72x128xf32>, vector<8x128xf32> -> vector<8x128xf32>
    %c0_7 = arith.constant 0 : index
    %c0_8 = arith.constant 0 : index
    %7 = vector.load %arg4[%c0_7, %c0_8] : memref<8x128xf32, #tpu.memory_space<vmem>>, vector<8x128xf32>
    tpu.vector_store %arg4[%c0_7, %c0_8], %6 {strides = array<i32>} : memref<8x128xf32, #tpu.memory_space<vmem>>, vector<8x128xf32>,
    return
  }
  func.func @transform_0(%arg0: i32) -> (i32, i32) {
    %c0_i32 = arith.constant 0 : i32
    %c0_i32_0 = arith.constant 0 : i32
    return %c0_i32, %arg0 : i32, i32
  }
  func.func @transform_1(%arg0: i32) -> (i32, i32) {
    %c0_i32 = arith.constant 0 : i32
    %c0_i32_0 = arith.constant 0 : i32
    %c0_i32_1 = arith.constant 0 : i32
    return %c0_i32, %c0_i32_0 : i32, i32
  }
  func.func @transform_2(%arg0: i32) -> (i32, i32) {
    %c0_i32 = arith.constant 0 : i32
    %c0_i32_0 = arith.constant 0 : i32
    %c0_i32_1 = arith.constant 0 : i32
    return %c0_i32, %c0_i32_0 : i32, i32
  }
  func.func @transform_3(%arg0: i32) -> (i32, i32) {
    %c0_i32 = arith.constant 0 : i32
    %c0_i32_0 = arith.constant 0 : i32
    return %c0_i32, %arg0 : i32, i32
  }
}

</mosaic_0001>

<bundles_post_ra>
// kernel: boston_model_forward.1
= control target key start
LH: loop header
LB: loop body
LE: loop exit
PB: predicated region body
PF: predicated region fallthrough
CT: control target
= control target key end

     0   :  { %v337_v0 = vmov 0.0   ;;  %vm338_vm0 = vmmov 0   ;;  %vm26_vm1 = vcmask 130048   ;;  %vm173_vm2 = vcmask 588800   ;;  %s438_s0 = inlined_call_operand.vmem [shape: f32[16,128], index: 0, kind: input, shape index: {}]   ;;  %s439_s1 = inlined_call_operand.vmem [shape: f32[72,16], index: 1, kind: input, shape index: {}]   ;;  %s440_s2 = inlined_call_operand.vmem [shape: f32[8,72], index: 2, kind: input, shape index: {}]   ;;  %s441_s3 = inlined_call_operand.vmem [shape: f32[8,128], index: 3, kind: output, shape index: {}]  }
   0x1   :  { %283 = vmatprep.subr.mxu0 %v337_v0  ;;  %v15_v1 = vld [vmem:[%s438_s0 + $0x8] sm:$0xff]  ;;  %v14_v2 = vld [vmem:[%s438_s0] sm:$0xff]  ;;  %287 = vmatprep.mubr.msk.f32.mxu0 %vm338_vm0, %v337_v0  ;;  %v18_v5 = vld [vmem:[%s439_s1 + $0x10] sm:$0xff] }
   0x2   :  { %284 = vmatpush3.msra.mxu0 %v15_v1  ;;  %v16_v3 = vld [vmem:[%s439_s1] sm:$0xff]  ;;  %314 = vmatprep.subr.mxu1 %v337_v0  ;;  %v17_v4 = vld [vmem:[%s439_s1 + $0x8] sm:$0xff]  ;;  %v19_v6 = vld [vmem:[%s439_s1 + $0x18] sm:$0xff] }
   0x3   :  { %285 = vmatprep.subr.mxu0 %v337_v0  ;;  %332 = vmatprep.mubr.msk.f32.mxu1 %vm338_vm0, %v337_v0  ;;  %v20_v7 = vld [vmem:[%s439_s1 + $0x20] sm:$0xff]  ;;  %v21_v8 = vld [vmem:[%s439_s1 + $0x28] sm:$0xff]  ;;  %v22_v9 = vld [vmem:[%s439_s1 + $0x30] sm:$0xff] }
   0x4   :  { %286 = vmatpush3.msra.mxu0 %v14_v2  ;;  %v23_v10 = vld [vmem:[%s439_s1 + $0x38] sm:$0xff]  ;;  %v24_v11 = vld [vmem:[%s439_s1 + $0x40] sm:$0xff] }
   0x5   :  { %288 = vmatmul.mubr.msk.f32.vlgmr.msra.gmra.mxu0 %vm26_vm1, %v16_v3  ;;  %v25_v39 = vld [vmem:[%s440_s2] sm:$0xff] }
   0x6   :  { %290 = vmatprep.mubr.msk.f32.mxu0 %vm338_vm0, %v337_v0 }
   0x9   :  { %291 = vmatmul.mubr.msk.f32.gmra.mxu0 %vm26_vm1, %v17_v4 }
   0xa   :  { %293 = vmatprep.mubr.msk.f32.mxu0 %vm338_vm0, %v337_v0 }
   0xd   :  { %294 = vmatmul.mubr.msk.f32.gmra.mxu0 %vm26_vm1, %v18_v5 }
   0xe   :  { %296 = vmatprep.mubr.msk.f32.mxu0 %vm338_vm0, %v337_v0 }
  0x11   :  { %297 = vmatmul.mubr.msk.f32.gmra.mxu0 %vm26_vm1, %v19_v6 }
  0x12   :  { %299 = vmatprep.mubr.msk.f32.mxu0 %vm338_vm0, %v337_v0 }
  0x15   :  { %300 = vmatmul.mubr.msk.f32.gmra.mxu0 %vm26_vm1, %v20_v7 }
  0x16   :  { %302 = vmatprep.mubr.msk.f32.mxu0 %vm338_vm0, %v337_v0 }
  0x19   :  { %303 = vmatmul.mubr.msk.f32.gmra.mxu0 %vm26_vm1, %v21_v8 }
  0x1a   :  { %305 = vmatprep.mubr.msk.f32.mxu0 %vm338_vm0, %v337_v0 }
  0x1d   :  { %306 = vmatmul.mubr.msk.f32.gmra.mxu0 %vm26_vm1, %v22_v9 }
  0x1e   :  { %308 = vmatprep.mubr.msk.f32.mxu0 %vm338_vm0, %v337_v0 }
  0x21   :  { %309 = vmatmul.mubr.msk.f32.gmra.mxu0 %vm26_vm1, %v23_v10 }
  0x22   :  { %311 = vmatprep.mubr.msk.f32.mxu0 %vm338_vm0, %v337_v0 }
  0x25   :  { %312 = vmatmul.mubr.msk.f32.gmra.mxu0 %vm26_vm1, %v24_v11 }
  0xc5   :  { %v120_v12 = vpop.f32.mrf.mxu0 }
  0xc6   :  { %v164_v38 = vmax.f32 %v120_v12, 0.0 }
  0xc7   :  { %v289_v13 = vpop.f32.mrf.mxu0 }
  0xc9   :  { %v125_v14 = vpop.f32.mrf.mxu0 }
  0xca   :  { %v165_v37 = vmax.f32 %v125_v14, 0.0 }
  0xcb   :  { %v292_v15 = vpop.f32.mrf.mxu0 }
  0xcd   :  { %v130_v16 = vpop.f32.mrf.mxu0 }
  0xce   :  { %v166_v36 = vmax.f32 %v130_v16, 0.0 }
  0xcf   :  { %v295_v17 = vpop.f32.mrf.mxu0 }
  0xd1   :  { %v135_v18 = vpop.f32.mrf.mxu0 }
  0xd2   :  { %v167_v35 = vmax.f32 %v135_v18, 0.0 }
  0xd3   :  { %v298_v19 = vpop.f32.mrf.mxu0 }
  0xd5   :  { %v140_v20 = vpop.f32.mrf.mxu0 }
  0xd6   :  { %v168_v34 = vmax.f32 %v140_v20, 0.0 }
  0xd7   :  { %v301_v21 = vpop.f32.mrf.mxu0 }
  0xd9   :  { %v145_v22 = vpop.f32.mrf.mxu0 }
  0xda   :  { %v169_v33 = vmax.f32 %v145_v22, 0.0 }
  0xdb   :  { %v304_v23 = vpop.f32.mrf.mxu0 }
  0xdd   :  { %v150_v24 = vpop.f32.mrf.mxu0 }
  0xde   :  { %v170_v32 = vmax.f32 %v150_v24, 0.0 }
  0xdf   :  { %v307_v25 = vpop.f32.mrf.mxu0 }
  0xe1   :  { %v155_v26 = vpop.f32.mrf.mxu0 }
  0xe2   :  { %v171_v31 = vmax.f32 %v155_v26, 0.0 }
  0xe3   :  { %v310_v27 = vpop.f32.mrf.mxu0 }
  0xe5   :  { %v160_v28 = vpop.f32.mrf.mxu0 }
  0xe6   :  { %v172_v29 = vmax.f32 %v160_v28, 0.0 }
  0xe7   :  { %v313_v30 = vpop.f32.mrf.mxu0 }
  0xe8   :  { %315 = vmatpush3.msra.mxu1 %v172_v29 }
  0xe9   :  { %316 = vmatprep.subr.mxu1 %v337_v0 }
  0xea   :  { %317 = vmatpush3.msra.mxu1 %v171_v31 }
  0xeb   :  { %318 = vmatprep.subr.mxu1 %v337_v0 }
  0xec   :  { %319 = vmatpush3.msra.mxu1 %v170_v32 }
  0xed   :  { %320 = vmatprep.subr.mxu1 %v337_v0 }
  0xee   :  { %321 = vmatpush3.msra.mxu1 %v169_v33 }
  0xef   :  { %322 = vmatprep.subr.mxu1 %v337_v0 }
  0xf0   :  { %323 = vmatpush3.msra.mxu1 %v168_v34 }
  0xf1   :  { %324 = vmatprep.subr.mxu1 %v337_v0 }
  0xf2   :  { %325 = vmatpush3.msra.mxu1 %v167_v35 }
  0xf3   :  { %326 = vmatprep.subr.mxu1 %v337_v0 }
  0xf4   :  { %327 = vmatpush3.msra.mxu1 %v166_v36 }
  0xf5   :  { %328 = vmatprep.subr.mxu1 %v337_v0 }
  0xf6   :  { %329 = vmatpush3.msra.mxu1 %v165_v37 }
  0xf7   :  { %330 = vmatprep.subr.mxu1 %v337_v0 }
  0xf8   :  { %331 = vmatpush3.msra.mxu1 %v164_v38 }
  0xf9   :  { %333 = vmatmul.mubr.msk.f32.vlgmr.msra.gmra.mxu1 %vm173_vm2, %v25_v39 }
 0x1b9   :  { %v243_v40 = vpop.f32.mrf.mxu1 }
 0x1ba   :  { %247 = vst [vmem:[%s441_s3] sm:$0xff] %v243_v40 }
 0x1bb   :  { %v334_v41 = vpop.f32.mrf.mxu1 }

</bundles_post_ra>
